<compile_context>
chip_gen: v5e
topology: v5e:2x2
jax: 0.10.0
libtpu: 0.0.40
codegen_flags: <defaults>
</compile_context>

<pallas_src>
import jax
import jax.numpy as jnp
from jax.experimental import pallas as pl
from jax.experimental.pallas import tpu as pltpu


def _round_up(n, m):
    return ((n + m - 1) // m) * m


def mlp_kernel(x_ref, w1_ref, b1_ref, w2_ref, b2_ref, w3_ref, b3_ref, o_ref):
    # Batch-in-lanes layout: features along sublanes, batch along lanes.
    x = x_ref[...]  # (2, bt)

    # fc1 (in=2): a depth-2 contraction would use <2% of the MXU; two VPU
    # outer-product FMAs co-issue with the later real matmul.
    h1 = (w1_ref[:, 0:1] * x[0:1, :]
          + w1_ref[:, 1:2] * x[1:2, :]
          + b1_ref[...])                      # (100, bt)
    h1 = jnp.maximum(h1, 0.0)

    # fc2 (100 -> 10): the only contraction worth the MXU.
    h2 = jnp.dot(w2_ref[...], h1, preferred_element_type=jnp.float32) + b2_ref[...]
    h2 = jnp.maximum(h2, 0.0)                 # (10, bt)

    # fc3 (out=1): VPU broadcast multiply + XLU sublane reduction instead of
    # an MXU matmul that would waste 127/128 of the result tile.
    h3 = jnp.sum(h2 * w3_ref[...], axis=0, keepdims=True) + b3_ref[...]  # (1, bt)
    o_ref[...] = h3.astype(o_ref.dtype)


def mlp_forward(x, params, *, b_tile=8192):
    """x: (B, 2) float32.  params in PyTorch nn.Linear layout:
    w[out, in], b[out].  Returns (B, 1)."""
    w1, b1, w2, b2, w3, b3 = params
    B = x.shape[0]

    # Feature-major param shapes for the batch-in-lanes kernel.
    b1c = b1.reshape(-1, 1)          # (100, 1)
    b2c = b2.reshape(-1, 1)          # (10, 1)
    w3c = w3.reshape(-1, 1)          # (10, 1)
    b3c = b3.reshape(1, 1)           # (1, 1)

    # --- Tile / grid sizing -------------------------------------------------
    # Lanes come in 128s; balance the batch over grid steps, keeping >= 2
    # steps when possible so "parallel" can use both v7x TensorCores.
    Bp128 = _round_up(B, 128)
    grid_n = max(1, pl.cdiv(Bp128, b_tile))
    if Bp128 >= 256:
        grid_n = max(grid_n, 2)
    bt = _round_up(pl.cdiv(Bp128, grid_n), 128)
    Bp = bt * grid_n

    # Batch-in-lanes relayout.  The zero-pad is fused with the transpose copy
    # by XLA, so it does not add a separate HBM pass.
    xT = jnp.transpose(x)            # (2, B)
    if Bp != B:
        xT = jnp.pad(xT, ((0, 0), (0, Bp - B)))

    # Weights / biases: full block, constant index_map -> stay VMEM-resident
    # while activation tiles stream (total < 5 KiB of parameters).
    const = lambda a: pl.BlockSpec(a.shape, lambda i: (0,) * a.ndim)

    flops = 2 * Bp * (2 * 100 + 100 * 10 + 10 * 1)
    param_bytes = sum(int(p.size) * p.dtype.itemsize
                      for p in (w1, b1c, w2, b2c, w3c, b3c))
    bytes_accessed = Bp * (2 + 1) * 4 + param_bytes

    out = pl.pallas_call(
        mlp_kernel,
        out_shape=jax.ShapeDtypeStruct((1, Bp), jnp.float32),
        grid=(grid_n,),
        in_specs=[
            # Lane-dense streamed activations: (2, bt), bt % 128 == 0.
            pl.BlockSpec((2, bt), lambda i: (0, i)),
            const(w1), const(b1c),
            const(w2), const(b2c),
            const(w3c), const(b3c),
        ],
        # Lane-dense output block -> unmasked stores, contiguous writeback DMA.
        out_specs=pl.BlockSpec((1, bt), lambda i: (0, i)),
        compiler_params=pltpu.CompilerParams(
            # Batch tiles are independent -> shard across TCs on v7x megacore.
            dimension_semantics=("parallel",),
        ),
        cost_estimate=pl.CostEstimate(
            flops=flops, transcendentals=0, bytes_accessed=bytes_accessed),
    )(xT, w1, b1c, w2, b2c, w3c, b3c)

    return out[0, :B].reshape(B, 1)


def init_params(key):
    """Deterministic init mimicking PyTorch's default Linear init
    (uniform(-1/sqrt(fan_in), 1/sqrt(fan_in))).  Layout matches nn.Linear:
    weight [out, in], bias [out]."""
    def linear(key, fan_in, fan_out):
        kw, kb = jax.random.split(key)
        bound = 1.0 / jnp.sqrt(fan_in)
        w = jax.random.uniform(kw, (fan_out, fan_in), jnp.float32, -bound, bound)
        b = jax.random.uniform(kb, (fan_out,), jnp.float32, -bound, bound)
        return w, b

    k1, k2, k3 = jax.random.split(key, 3)
    w1, b1 = linear(k1, 2, 100)
    w2, b2 = linear(k2, 100, 10)
    w3, b3 = linear(k3, 10, 1)
    return w1, b1, w2, b2, w3, b3


if __name__ == "__main__":
    key = jax.random.PRNGKey(0)
    kp, kx = jax.random.split(key)
    params = init_params(kp)

    batch = 8
    x = jax.random.normal(kx, (batch, 2), jnp.float32)

    out = mlp_forward(x, params)
    out = jax.block_until_ready(out)

    # Sanity-check against a plain-JAX reference of the same forward pass
    # (PyTorch convention: y = x @ W.T + b).
    w1, b1, w2, b2, w3, b3 = params
    ref = jnp.maximum(x @ w1.T + b1, 0.0)
    ref = jnp.maximum(ref @ w2.T + b2, 0.0)
    ref = ref @ w3.T + b3
    assert out.shape == (batch, 1)
    assert jnp.allclose(out, ref, atol=1e-5, rtol=1e-5)

    print("KERNEL_OK")
</pallas_src>

<mosaic_0001>
module attributes {stable_mosaic.version = 11 : i64} {
  func.func @mlp_kernel(%arg0: i32, %arg1: memref<2x128xf32, #tpu.memory_space<vmem>>, %arg2: memref<100x2xf32, #tpu.memory_space<vmem>>, %arg3: memref<100x1xf32, #tpu.memory_space<vmem>>, %arg4: memref<10x100xf32, #tpu.memory_space<vmem>>, %arg5: memref<10x1xf32, #tpu.memory_space<vmem>>, %arg6: memref<10x1xf32, #tpu.memory_space<vmem>>, %arg7: memref<1x1xf32, #tpu.memory_space<vmem>>, %arg8: memref<1x128xf32, #tpu.memory_space<vmem>>) attributes {dimension_semantics = [#tpu.dimension_semantics<parallel>], iteration_bounds = array<i64: 1>, scalar_prefetch = 0 : i64, scratch_operands = 0 : i64, tpu.core_type = #tpu.core_type<tc>, window_params = [{transform_indices = @transform_0, window_bounds = array<i64: 2, 128>}, {pipeline_mode = #tpu.pipeline_mode<synchronous>, transform_indices = @transform_1, window_bounds = array<i64: 100, 2>}, {pipeline_mode = #tpu.pipeline_mode<synchronous>, transform_indices = @transform_2, window_bounds = array<i64: 100, 1>}, {pipeline_mode = #tpu.pipeline_mode<synchronous>, transform_indices = @transform_3, window_bounds = array<i64: 10, 100>}, {pipeline_mode = #tpu.pipeline_mode<synchronous>, transform_indices = @transform_4, window_bounds = array<i64: 10, 1>}, {pipeline_mode = #tpu.pipeline_mode<synchronous>, transform_indices = @transform_5, window_bounds = array<i64: 10, 1>}, {pipeline_mode = #tpu.pipeline_mode<synchronous>, transform_indices = @transform_6, window_bounds = array<i64: 1, 1>}, {transform_indices = @transform_7, window_bounds = array<i64: 1, 128>}]} {
    %c0 = arith.constant 0 : index
    %c0_0 = arith.constant 0 : index
    %0 = vector.load %arg1[%c0, %c0_0] : memref<2x128xf32, #tpu.memory_space<vmem>>, vector<2x128xf32>
    %c0_1 = arith.constant 0 : index
    %c0_2 = arith.constant 0 : index
    %1 = vector.load %arg2[%c0_1, %c0_2] : memref<100x2xf32, #tpu.memory_space<vmem>>, vector<100x1xf32>
    %2 = vector.extract_strided_slice %0 {offsets = [0, 0], sizes = [1, 128], strides = [1, 1]} : vector<2x128xf32> to vector<1x128xf32>
    %3 = vector.broadcast %1 : vector<100x1xf32> to vector<100x128xf32>
    %4 = vector.broadcast %2 : vector<1x128xf32> to vector<100x128xf32>
    %5 = arith.mulf %3, %4 : vector<100x128xf32>
    %c0_3 = arith.constant 0 : index
    %c1 = arith.constant 1 : index
    %6 = vector.load %arg2[%c0_3, %c1] : memref<100x2xf32, #tpu.memory_space<vmem>>, vector<100x1xf32>
    %7 = vector.extract_strided_slice %0 {offsets = [1, 0], sizes = [1, 128], strides = [1, 1]} : vector<2x128xf32> to vector<1x128xf32>
    %8 = vector.broadcast %6 : vector<100x1xf32> to vector<100x128xf32>
    %9 = vector.broadcast %7 : vector<1x128xf32> to vector<100x128xf32>
    %10 = arith.mulf %8, %9 : vector<100x128xf32>
    %11 = arith.addf %5, %10 : vector<100x128xf32>
    %c0_4 = arith.constant 0 : index
    %c0_5 = arith.constant 0 : index
    %12 = vector.load %arg3[%c0_4, %c0_5] : memref<100x1xf32, #tpu.memory_space<vmem>>, vector<100x1xf32>
    %13 = vector.broadcast %12 : vector<100x1xf32> to vector<100x128xf32>
    %14 = arith.addf %11, %13 : vector<100x128xf32>
    %cst = arith.constant 0.000000e+00 : f32
    %15 = vector.broadcast %cst : f32 to vector<100x128xf32>
    %16 = arith.maximumf %14, %15 : vector<100x128xf32>
    %c0_6 = arith.constant 0 : index
    %c0_7 = arith.constant 0 : index
    %17 = vector.load %arg4[%c0_6, %c0_7] : memref<10x100xf32, #tpu.memory_space<vmem>>, vector<10x100xf32>
    %cst_8 = arith.constant dense<0.000000e+00> : vector<10x128xf32>
    %18 = tpu.matmul %17, %16, %cst_8 {dimension_numbers = #tpu.dot_dimension_numbers<[1], [0], [0], [1], [0, 0, 1, 1], [], []>} : vector<10x100xf32>, vector<100x128xf32>, vector<10x128xf32> -> vector<10x128xf32>
    %c0_9 = arith.constant 0 : index
    %c0_10 = arith.constant 0 : index
    %19 = vector.load %arg5[%c0_9, %c0_10] : memref<10x1xf32, #tpu.memory_space<vmem>>, vector<10x1xf32>
    %20 = vector.broadcast %19 : vector<10x1xf32> to vector<10x128xf32>
    %21 = arith.addf %18, %20 : vector<10x128xf32>
    %cst_11 = arith.constant 0.000000e+00 : f32
    %22 = vector.broadcast %cst_11 : f32 to vector<10x128xf32>
    %23 = arith.maximumf %21, %22 : vector<10x128xf32>
    %c0_12 = arith.constant 0 : index
    %c0_13 = arith.constant 0 : index
    %24 = vector.load %arg6[%c0_12, %c0_13] : memref<10x1xf32, #tpu.memory_space<vmem>>, vector<10x1xf32>
    %25 = vector.broadcast %24 : vector<10x1xf32> to vector<10x128xf32>
    %26 = arith.mulf %23, %25 : vector<10x128xf32>
    %cst_14 = arith.constant dense<0.000000e+00> : vector<128xf32>
    %27 = vector.multi_reduction <add>, %26, %cst_14 [0] : vector<10x128xf32> to vector<128xf32>
    %28 = vector.shape_cast %27 : vector<128xf32> to vector<1x128xf32>
    %c0_15 = arith.constant 0 : index
    %c0_16 = arith.constant 0 : index
    %29 = vector.load %arg7[%c0_15, %c0_16] : memref<1x1xf32, #tpu.memory_space<vmem>>, vector<1x1xf32>
    %30 = vector.broadcast %29 : vector<1x1xf32> to vector<1x128xf32>
    %31 = arith.addf %28, %30 : vector<1x128xf32>
    %c0_17 = arith.constant 0 : index
    %c0_18 = arith.constant 0 : index
    %32 = vector.load %arg8[%c0_17, %c0_18] : memref<1x128xf32, #tpu.memory_space<vmem>>, vector<1x128xf32>
    tpu.vector_store %arg8[%c0_17, %c0_18], %31 {strides = array<i32>} : memref<1x128xf32, #tpu.memory_space<vmem>>, vector<1x128xf32>,
    return
  }
  func.func @transform_0(%arg0: i32) -> (i32, i32) {
    %c0_i32 = arith.constant 0 : i32
    %c0_i32_0 = arith.constant 0 : i32
    return %c0_i32, %arg0 : i32, i32
  }
  func.func @transform_1(%arg0: i32) -> (i32, i32) {
    %c0_i32 = arith.constant 0 : i32
    %c0_i32_0 = arith.constant 0 : i32
    %c0_i32_1 = arith.constant 0 : i32
    return %c0_i32, %c0_i32_0 : i32, i32
  }
  func.func @transform_2(%arg0: i32) -> (i32, i32) {
    %c0_i32 = arith.constant 0 : i32
    %c0_i32_0 = arith.constant 0 : i32
    %c0_i32_1 = arith.constant 0 : i32
    return %c0_i32, %c0_i32_0 : i32, i32
  }
  func.func @transform_3(%arg0: i32) -> (i32, i32) {
    %c0_i32 = arith.constant 0 : i32
    %c0_i32_0 = arith.constant 0 : i32
    %c0_i32_1 = arith.constant 0 : i32
    return %c0_i32, %c0_i32_0 : i32, i32
  }
  func.func @transform_4(%arg0: i32) -> (i32, i32) {
    %c0_i32 = arith.constant 0 : i32
    %c0_i32_0 = arith.constant 0 : i32
    %c0_i32_1 = arith.constant 0 : i32
    return %c0_i32, %c0_i32_0 : i32, i32
  }
  func.func @transform_5(%arg0: i32) -> (i32, i32) {
    %c0_i32 = arith.constant 0 : i32
    %c0_i32_0 = arith.constant 0 : i32
    %c0_i32_1 = arith.constant 0 : i32
    return %c0_i32, %c0_i32_0 : i32, i32
  }
  func.func @transform_6(%arg0: i32) -> (i32, i32) {
    %c0_i32 = arith.constant 0 : i32
    %c0_i32_0 = arith.constant 0 : i32
    %c0_i32_1 = arith.constant 0 : i32
    return %c0_i32, %c0_i32_0 : i32, i32
  }
  func.func @transform_7(%arg0: i32) -> (i32, i32) {
    %c0_i32 = arith.constant 0 : i32
    %c0_i32_0 = arith.constant 0 : i32
    return %c0_i32, %arg0 : i32, i32
  }
}

</mosaic_0001>

<bundles_post_ra>
// kernel: tpu_custom_call.1
= control target key start
LH: loop header
LB: loop body
LE: loop exit
PB: predicated region body
PF: predicated region fallthrough
CT: control target
= control target key end

     0   :  { %s692_s0 = inlined_call_operand.vmem [shape: f32[2,128], index: 0, kind: input, shape index: {}]   ;;  %s693_s1 = inlined_call_operand.vmem [shape: f32[100,2], index: 1, kind: input, shape index: {}]   ;;  %s694_s2 = inlined_call_operand.vmem [shape: f32[100,1], index: 2, kind: input, shape index: {}]   ;;  %s695_s3 = inlined_call_operand.vmem [shape: f32[10,100], index: 3, kind: input, shape index: {}]   ;;  %s696_s4 = inlined_call_operand.vmem [shape: f32[10,1], index: 4, kind: input, shape index: {}]   ;;  %s697_s5 = inlined_call_operand.vmem [shape: f32[10,1], index: 5, kind: input, shape index: {}]   ;;  %s698_s6 = inlined_call_operand.<no memory space> [shape: f32[1,1], index: 6, kind: input, shape index: {}]   ;;  %s699_s7 = inlined_call_operand.hbm [shape: f32[1,128], index: 7, kind: output, shape index: {}]  }
   0x1   :  { %v12_v0 = vstv %s698_s6 }
   0x2   :  { %13 = vst [vmem:[#allocation2] sm:$0x1] %v12_v0 }
   0x3   :  { %v40_v1 = vld [vmem:[%s693_s1 + $0x50] sm:$0xff]  ;;  %v520_v2 = vld [vmem:[%s693_s1 + $0x20] sm:$0xff]  ;;  %v468_v4 = vmov 1   ;;  %v469_v5 = vmov 0  }
   0x4   :  { %v525_v3 = vld [vmem:[%s693_s1 + $0x10] sm:$0xff]  ;;  %427 = vset.pattern.permute.xlu0 %v468_v4  ;;  %423 = vset.pattern.permute.xlu2 %v469_v5 }
   0x5   :  { %422 = vset.pattern.permute.xlu1 %v469_v5  ;;  %163 = vperm.xlu0 %427, %v40_v1  }
   0x6   :  { %65 = vperm.xlu2 %423, %v520_v2   ;;  %55 = vperm.xlu1 %422, %v525_v3  }
   0x7   :  { %14 = vsyncpa [#allocation4], 0  ;;  %v35_v6 = vld [vmem:[%s693_s1 + $0x28] sm:$0xff]  ;;  %v33_v7 = vld [vmem:[%s693_s1 + $0x18] sm:$0xff]  ;;  %vm326_vm0 = vcmask 1043456   ;;  %vm319_vm1 = vcmask 818176  }
   0x8   :  { %v42_v8 = vld [vmem:[%s693_s1 + $0x60] sm:$0xf]  ;;  %v41_v10 = vld [vmem:[%s693_s1 + $0x58] sm:$0xff]  ;;  %v31_v11 = vld [vmem:[%s693_s1 + $0x8] sm:$0xff]  ;;  %vm369_vm2 = vcmask 1041408   ;;  %s394_s17 = sshll.u32 %s699_s7, 4  ;;  %s395_s17 = int_to_ptr.hbm [resolvable:$true] %s394_s17 }
   0x9   :  { %v30_v9 = vld [vmem:[%s693_s1] sm:$0xff]  ;;  %v36_v12 = vld [vmem:[%s693_s1 + $0x30] sm:$0xff]  ;;  %v39_v13 = vld [vmem:[%s693_s1 + $0x48] sm:$0xff] }
   0xa   :  { %v213_v14 = vld [vmem:[%s694_s2 + $0x60] sm:$0xf]  ;;  %v212_v15 = vld [vmem:[%s694_s2 + $0x58] sm:$0xff]  ;;  %v211_v17 = vld [vmem:[%s694_s2 + $0x50] sm:$0xff] }
   0xb   :  { %v38_v16 = vld [vmem:[%s693_s1 + $0x40] sm:$0xff]  ;;  %v210_v18 = vld [vmem:[%s694_s2 + $0x48] sm:$0xff]  ;;  %v37_v19 = vld [vmem:[%s693_s1 + $0x38] sm:$0xff] }
   0xc   :  { %v206_v20 = vld [vmem:[%s694_s2 + $0x28] sm:$0xff]  ;;  %v209_v21 = vld [vmem:[%s694_s2 + $0x40] sm:$0xff]  ;;  %v208_v22 = vld [vmem:[%s694_s2 + $0x38] sm:$0xff] }
   0xd   :  { %143 = vperm.xlu0 %427, %v35_v6   ;;  %v207_v23 = vld [vmem:[%s694_s2 + $0x30] sm:$0xff]  ;;  %v205_v25 = vld [vmem:[%s694_s2 + $0x20] sm:$0xff]  ;;  %v204_v27 = vld [vmem:[%s694_s2 + $0x18] sm:$0xff] }
   0xe   :  { %70 = vperm.xlu2 %423, %v35_v6   ;;  %60 = vperm.xlu1 %422, %v33_v7   ;;  %v202_v28 = vld [vmem:[%s694_s2 + $0x8] sm:$0xff]  ;;  %v203_v30 = vld [vmem:[%s694_s2 + $0x10] sm:$0xff]  ;;  %v29_v33 = vld [vmem:[%s692_s0] sm:$0x3] }
   0xf   :  { %v308_v34 = vld [vmem:[%s696_s4 + $0x8] sm:$0x3]  ;;  %v627_v36 = vperm.slane %v29_v33, 0  ;;  %v629_v37 = vperm.slane %v29_v33, 1  ;;  %v201_v38 = vld [vmem:[%s694_s2] sm:$0xff] }
  0x10   :  { %v355_v43 = vld [vmem:[%s697_s5] sm:$0xff]  ;;  %v356_v46 = vld [vmem:[%s697_s5 + $0x8] sm:$0x3] }
  0x11   :  { %v378_v50 = vld [vmem:[#allocation2] sm:$0x1] }
  0x15   :  { %434 = vset.pattern.permute.xlu0 %v469_v5 }
  0x16   :  { %424 = vset.pattern.permute.xlu2 %v468_v4  ;;  %105 = vperm.xlu1 %422, %v42_v8  }
  0x17   :  { %171 = vperm.xlu2 %424, %v42_v8   ;;  %45 = vperm.xlu0 %434, %v30_v9  }
  0x1e   :  { %425 = vset.pattern.permute.xlu1 %v468_v4 }
  0x1f   :  { %426 = vset.pattern.permute.xlu2 %v469_v5  ;;  %167 = vperm.xlu1 %425, %v41_v10  }
  0x20   :  { %50 = vperm.xlu0 %434, %v31_v11   ;;  %95 = vperm.xlu2 %426, %v40_v1  }
  0x27   :  { %428 = vset.pattern.permute.xlu1 %v469_v5 }
  0x28   :  { %75 = vperm.xlu0 %434, %v36_v12   ;;  %90 = vperm.xlu2 %426, %v39_v13  }
  0x29   :  { %276 = vperm.xlu1 %428, %v213_v14  }
  0x30   :  { %100 = vperm.xlu0 %434, %v41_v10   ;;  %271 = vperm.xlu2 %426, %v212_v15  }
  0x31   :  { %429 = vset.pattern.permute.xlu1 %v468_v4 }
  0x32   :  { %159 = vperm.xlu1 %429, %v39_v13  }
  0x38   :  { %85 = vperm.xlu0 %434, %v38_v16   ;;  %266 = vperm.xlu2 %426, %v211_v17  }
  0x3a   :  { %155 = vperm.xlu1 %429, %v38_v16  }
  0x40   :  { %261 = vperm.xlu0 %434, %v210_v18   ;;  %431 = vset.pattern.permute.xlu2 %v468_v4 }
  0x41   :  { %151 = vperm.xlu2 %431, %v37_v19  }
  0x42   :  { %430 = vset.pattern.permute.xlu1 %v469_v5 }
  0x43   :  { %80 = vperm.xlu1 %430, %v37_v19  }
  0x48   :  { %241 = vperm.xlu0 %434, %v206_v20  }
  0x49   :  { %433 = vset.pattern.permute.xlu2 %v469_v5 }
  0x4a   :  { %256 = vperm.xlu2 %433, %v209_v21  }
  0x4b   :  { %432 = vset.pattern.permute.xlu1 %v468_v4 }
  0x4c   :  { %147 = vperm.xlu1 %432, %v36_v12  }
  0x50   :  { %439 = vset.pattern.permute.xlu0 %v468_v4 }
  0x51   :  { %123 = vperm.xlu0 %439, %v30_v9  }
  0x52   :  { %436 = vset.pattern.permute.xlu2 %v468_v4 }
  0x53   :  { %139 = vperm.xlu2 %436, %v520_v2  }
  0x54   :  { %435 = vset.pattern.permute.xlu1 %v469_v5 }
  0x55   :  { %251 = vperm.xlu1 %435, %v208_v22  }
  0x59   :  { %441 = vset.pattern.permute.xlu0 %v469_v5 }
  0x5b   :  { %135 = vperm.xlu2 %436, %v33_v7  }
  0x5d   :  { %246 = vperm.xlu1 %435, %v207_v23  }
  0x60   :  { %v601_v24 = vpop.permute.xlu2 %65 }
  0x63   :  { %438 = vset.pattern.permute.xlu2 %v469_v5 }
  0x64   :  { %236 = vperm.xlu2 %438, %v205_v25  }
  0x65   :  { %437 = vset.pattern.permute.xlu1 %v468_v4 }
  0x66   :  { %131 = vperm.xlu1 %437, %v525_v3  }
  0x68   :  { %v71_v26 = vpop.permute.xlu2 %70 }
  0x69   :  { %v114_v39 = vmul.f32 %v627_v36, %v71_v26 }
  0x6c   :  { %231 = vperm.xlu2 %438, %v204_v27  }
  0x6e   :  { %127 = vperm.xlu1 %437, %v31_v11  }
  0x71   :  { %v172_v29 = vpop.permute.xlu2 %171 }
  0x72   :  { %v187_v54 = vmul.f32 %v629_v37, %v172_v29 }
  0x74   :  { %221 = vperm.xlu2 %438, %v202_v28  }
  0x76   :  { %440 = vset.pattern.permute.xlu1 %v469_v5 }
  0x77   :  { %226 = vperm.xlu1 %440, %v203_v30   ;;  %v164_v31 = vpop.permute.xlu0 %163 }
  0x78   :  { %v619_v32 = vpop.permute.xlu1 %55  ;;  %v185_v61 = vmul.f32 %v629_v37, %v164_v31 }
  0x7a   :  { %v96_v35 = vpop.permute.xlu2 %95 }
  0x7b   :  { %v119_v62 = vmul.f32 %v627_v36, %v96_v35 }
  0x7c   :  { %316 = vperm.xlu2 %438, %v308_v34  }
  0x7d   :  { %v198_v2 = vadd.f32 %v185_v61, %v119_v62 }
  0x7f   :  { %216 = vperm.xlu1 %440, %v201_v38   ;;  %v144_v40 = vpop.permute.xlu0 %143 }
  0x80   :  { %v180_v41 = vmul.f32 %v629_v37, %v144_v40  ;;  %v636_v42 = vpop.permute.xlu1 %60 }
  0x82   :  { %v91_v44 = vpop.permute.xlu2 %90  ;;  %v641_v45 = vadd.f32 %v180_v41, %v114_v39 }
  0x83   :  { %v118_v16 = vmul.f32 %v627_v36, %v91_v44  ;;  %v113_v44 = vmul.f32 %v627_v36, %v601_v24 }
  0x84   :  { %359 = vperm.xlu2 %438, %v355_v43  }
  0x87   :  { %364 = vperm.xlu1 %440, %v356_v46  }
  0x88   :  { %v106_v47 = vpop.permute.xlu1 %105 }
  0x89   :  { %v646_v48 = vpop.permute.xlu0 %45  ;;  %v121_v55 = vmul.f32 %v627_v36, %v106_v47 }
  0x8a   :  { %v272_v49 = vpop.permute.xlu2 %271 }
  0x8b   :  { %v200_v57 = vadd.f32 %v187_v54, %v121_v55 }
  0x8f   :  { %381 = vperm.xlu1 %440, %v378_v50   ;;  %v112_v50 = vmul.f32 %v627_v36, %v636_v42 }
  0x91   :  { %v168_v51 = vpop.permute.xlu1 %167 }
  0x92   :  { %v648_v52 = vpop.permute.xlu0 %50  ;;  %v267_v53 = vpop.permute.xlu2 %266  ;;  %v186_v1 = vmul.f32 %v629_v37, %v168_v51 }
  0x93   :  { %v289_v6 = vadd.f32 %v267_v53, %v198_v2  ;;  %v111_v2 = vmul.f32 %v627_v36, %v619_v32 }
  0x95   :  { %v302_v11 = vmax.f32 %v289_v6, 0.0 }
  0x9a   :  { %v76_v56 = vpop.permute.xlu0 %75 }
  0x9b   :  { %v277_v58 = vpop.permute.xlu1 %276  ;;  %v152_v63 = vpop.permute.xlu2 %151  ;;  %v115_v40 = vmul.f32 %v627_v36, %v76_v56 }
  0x9c   :  { %v291_v59 = vadd.f32 %v277_v58, %v200_v57  ;;  %v182_v29 = vmul.f32 %v629_v37, %v152_v63 }
  0x9e   :  { %v304_v60 = vmax.f32 %v291_v59, 0.0 }
  0xa0   :  { %403 = vmatpush.msk.msra.mxu0 %vm326_vm0, %v304_v60  ;;  %406 = vmatpush.msk.msra.mxu1 %vm326_vm0, %v304_v60 }
  0xa2   :  { %v101_v0 = vpop.permute.xlu0 %100 }
  0xa3   :  { %v120_v3 = vmul.f32 %v627_v36, %v101_v0  ;;  %v110_v0 = vmul.f32 %v627_v36, %v648_v52 }
  0xa4   :  { %v160_v4 = vpop.permute.xlu1 %159  ;;  %v257_v8 = vpop.permute.xlu2 %256 }
  0xa5   :  { %v199_v5 = vadd.f32 %v186_v1, %v120_v3  ;;  %v184_v14 = vmul.f32 %v629_v37, %v160_v4 }
  0xa7   :  { %v290_v7 = vadd.f32 %v272_v49, %v199_v5  ;;  %v197_v18 = vadd.f32 %v184_v14, %v118_v16  ;;  %v305_v16 = vld [vmem:[%s695_s3] sm:$0xff] }
  0xa9   :  { %v303_v9 = vmax.f32 %v290_v7, 0.0 }
  0xaa   :  { %v86_v10 = vpop.permute.xlu0 %85 }
  0xab   :  { %v117_v12 = vmul.f32 %v627_v36, %v86_v10  ;;  %334 = vmatpush.msra.mxu0 %v303_v9  ;;  %407 = vmatpush.msra.mxu1 %v303_v9 }
  0xac   :  { %v156_v13 = vpop.permute.xlu1 %155 }
  0xad   :  { %v183_v15 = vmul.f32 %v629_v37, %v156_v13  ;;  %335 = vmatpush.msra.mxu0 %v302_v11  ;;  %408 = vmatpush.msra.mxu1 %v302_v11  ;;  %v140_v20 = vpop.permute.xlu2 %139 }
  0xae   :  { %v179_v41 = vmul.f32 %v629_v37, %v140_v20 }
  0xaf   :  { %v196_v17 = vadd.f32 %v183_v15, %v117_v12  ;;  %v109_v12 = vmul.f32 %v627_v36, %v646_v48 }
  0xb0   :  { %v192_v53 = vadd.f32 %v179_v41, %v113_v44 }
  0xb1   :  { %v287_v22 = vadd.f32 %v257_v8, %v196_v17 }
  0xb2   :  { %v262_v19 = vpop.permute.xlu0 %261 }
  0xb3   :  { %v288_v21 = vadd.f32 %v262_v19, %v197_v18  ;;  %v300_v26 = vmax.f32 %v287_v22, 0.0 }
  0xb5   :  { %v301_v23 = vmax.f32 %v288_v21, 0.0  ;;  %v81_v25 = vpop.permute.xlu1 %80  ;;  %v136_v27 = vpop.permute.xlu2 %135 }
  0xb6   :  { %v116_v30 = vmul.f32 %v627_v36, %v81_v25  ;;  %v178_v46 = vmul.f32 %v629_v37, %v136_v27 }
  0xb7   :  { %336 = vmatpush.msra.mxu0 %v301_v23  ;;  %409 = vmatpush.msra.mxu1 %v301_v23 }
  0xb8   :  { %v195_v31 = vadd.f32 %v182_v29, %v116_v30  ;;  %v191_v57 = vadd.f32 %v178_v46, %v112_v50 }
  0xb9   :  { %337 = vmatpush.msra.mxu0 %v300_v26  ;;  %410 = vmatpush.msra.mxu1 %v300_v26 }
  0xba   :  { %v242_v43 = vpop.permute.xlu0 %241 }
  0xbb   :  { %v284_v51 = vadd.f32 %v242_v43, %v641_v45  ;;  %v307_v45 = vld [vmem:[%s696_s4] sm:$0xff] }
  0xbc   :  { %311 = vperm.xlu0 %441, %v307_v45  }
  0xbd   :  { %v297_v59 = vmax.f32 %v284_v51, 0.0 }
  0xbe   :  { %v148_v28 = vpop.permute.xlu1 %147  ;;  %v237_v33 = vpop.permute.xlu2 %236 }
  0xbf   :  { %v181_v38 = vmul.f32 %v629_v37, %v148_v28  ;;  %v283_v56 = vadd.f32 %v237_v33, %v192_v53 }
  0xc1   :  { %v194_v47 = vadd.f32 %v181_v38, %v115_v40  ;;  %v296_v24 = vmax.f32 %v283_v56, 0.0 }
  0xc3   :  { %v124_v4 = vpop.permute.xlu0 %123 }
  0xc4   :  { %v175_v10 = vmul.f32 %v629_v37, %v124_v4 }
  0xc6   :  { %v232_v55 = vpop.permute.xlu2 %231  ;;  %v188_v13 = vadd.f32 %v175_v10, %v109_v12 }
  0xc7   :  { %v252_v34 = vpop.permute.xlu1 %251  ;;  %v282_v60 = vadd.f32 %v232_v55, %v191_v57 }
  0xc8   :  { %v286_v35 = vadd.f32 %v252_v34, %v195_v31 }
  0xc9   :  { %v295_v61 = vmax.f32 %v282_v60, 0.0 }
  0xca   :  { %v299_v39 = vmax.f32 %v286_v35, 0.0 }
  0xcc   :  { %338 = vmatpush.msra.mxu0 %v299_v39  ;;  %411 = vmatpush.msra.mxu1 %v299_v39 }
  0xce   :  { %v222_v6 = vpop.permute.xlu2 %221 }
  0xcf   :  { %v247_v49 = vpop.permute.xlu1 %246 }
  0xd0   :  { %v285_v54 = vadd.f32 %v247_v49, %v194_v47 }
  0xd2   :  { %v298_v58 = vmax.f32 %v285_v54, 0.0 }
  0xd4   :  { %339 = vmatpush.msra.mxu0 %v298_v58  ;;  %412 = vmatpush.msra.mxu1 %v298_v58 }
  0xd6   :  { %340 = vmatpush.msra.mxu0 %v297_v59  ;;  %413 = vmatpush.msra.mxu1 %v297_v59  ;;  %v317_v36 = vpop.permute.xlu2 %316 }
  0xd8   :  { %v132_v62 = vpop.permute.xlu1 %131  ;;  %341 = vmatpush.msra.mxu0 %v296_v24  ;;  %414 = vmatpush.msra.mxu1 %v296_v24 }
  0xd9   :  { %v177_v1 = vmul.f32 %v629_v37, %v132_v62 }
  0xda   :  { %342 = vmatpush.msra.mxu0 %v295_v61  ;;  %415 = vmatpush.msra.mxu1 %v295_v61 }
  0xdb   :  { %v190_v5 = vadd.f32 %v177_v1, %v111_v2 }
  0xde   :  { %v360_v23 = vpop.permute.xlu2 %359 }
  0xe0   :  { %v128_v42 = vpop.permute.xlu1 %127 }
  0xe1   :  { %v176_v63 = vmul.f32 %v629_v37, %v128_v42  ;;  %v306_v37 = vld [vmem:[%s695_s3 + $0x8] sm:$0x3]  ;;  %s470_s3 = smov [#allocation3]  }
  0xe2   :  { %s392_s15 = sshll.u32 %s470_s3, 4  ;;  %s393_s15 = int_to_ptr.vmem [resolvable:$true] %s392_s15 }
  0xe3   :  { %v189_v3 = vadd.f32 %v176_v63, %v110_v0 }
  0xe5   :  { %v280_v9 = vadd.f32 %v222_v6, %v189_v3 }
  0xe7   :  { %v293_v52 = vmax.f32 %v280_v9, 0.0 }
  0xe9   :  { %v227_v7 = vpop.permute.xlu1 %226 }
  0xea   :  { %v281_v8 = vadd.f32 %v227_v7, %v190_v5 }
  0xec   :  { %v294_v11 = vmax.f32 %v281_v8, 0.0 }
  0xee   :  { %343 = vmatpush.msra.mxu0 %v294_v11  ;;  %416 = vmatpush.msra.mxu1 %v294_v11 }
  0xf0   :  { %344 = vmatpush.msra.mxu0 %v293_v52  ;;  %417 = vmatpush.msra.mxu1 %v293_v52 }
  0xf1   :  { %v217_v32 = vpop.permute.xlu1 %216 }
  0xf2   :  { %v279_v14 = vadd.f32 %v217_v32, %v188_v13 }
  0xf4   :  { %v292_v15 = vmax.f32 %v279_v14, 0.0 }
  0xf6   :  { %345 = vmatpush.msra.mxu0 %v292_v15  ;;  %418 = vmatpush.msra.mxu1 %v292_v15 }
  0xf7   :  { %404 = vmatmul.msk.f32.vlgmr.msra.gmra.mxu0 %vm319_vm1, %v305_v16  ;;  %405 = vmatmul.msk.f32.vlgmr.msra.gmra.mxu1 %vm319_vm1, %v306_v37 }
  0xf9   :  { %v365_v25 = vpop.permute.xlu1 %364 }
 0x101   :  { %v382_v35 = vpop.permute.xlu1 %381 }
 0x102   :  { %v384_v39 = vperm.slane %v382_v35, 0 }
 0x12e   :  { %v312_v48 = vpop.permute.xlu0 %311 }
 0x174   :  { %v347_v17 = vpop.f32.mrf.mxu0  ;;  %v350_v18 = vpop.f32.mrf.mxu1 }
 0x175   :  { %v348_v19 = vadd.f32 %v347_v17, %v312_v48  ;;  %v351_v20 = vadd.f32 %v350_v18, %v317_v36 }
 0x177   :  { %v353_v21 = vmax.f32 %v348_v19, 0.0  ;;  %v354_v22 = vmax.f32 %v351_v20, 0.0 }
 0x179   :  { %v367_v26 = vmul.f32 %v360_v23, %v353_v21  ;;  %v368_v27 = vmul.f32 %v365_v25, %v354_v22 }
 0x17b   :  { %v370_v28 = vsel %vm369_vm2, %v368_v27, 0.0 }
 0x17c   :  { %v371_v29 = vadd.f32 %v370_v28, %v367_v26 }
 0x17e   :  { %v372_v30 = vrot.slane %v371_v29, 4 }
 0x180   :  { %v373_v31 = vadd.f32 %v372_v30, %v371_v29 }
 0x182   :  { %v374_v33 = vrot.slane %v373_v31, 2 }
 0x184   :  { %v375_v34 = vadd.f32 %v374_v33, %v373_v31 }
 0x186   :  { %v376_v38 = vrot.slane %v375_v34, 1 }
 0x188   :  { %v377_v40 = vadd.f32 %v376_v38, %v375_v34 }
 0x18a   :  { %v385_v41 = vadd.f32 %v384_v39, %v377_v40 }
 0x18c   :  { %386 = vst [vmem:[#allocation3] sm:$0x1] %v385_v41 }
 0x18d   :  { %397 = dma.vmem_to_hbm [thread:$0]  %s393_s15, 16, %s395_s17, [#allocation4]  }
 0x18e   :  { %466 = dma.done.wait [#allocation4], 16  }
 0x18f   :  { %467 = vsyncadd [#allocation4], 4294967280 }
 0x190   :  { %402 = vsyncpa [#allocation4], 1 }

</bundles_post_ra>
